<compile_context>
chip_gen: v6e
topology: v6e:2x2x1
jax: 0.10.0
libtpu: 0.0.40
codegen_flags: <defaults>
</compile_context>

<pallas_src>
import math
from functools import lru_cache, partial

import jax
import jax.numpy as jnp
from jax.experimental import pallas as pl
from jax.experimental.pallas import tpu as pltpu


# ---------------------------------------------------------------------------
# VMEM sizing helpers
# ---------------------------------------------------------------------------

@lru_cache(maxsize=1)
def _vmem_config():
    """(group-size budget, scoped-vmem limit) derived from the actual part.

    v5e/v6e expose 128 MiB of VMEM -> generous budget; v7x has only 64 MiB per
    TensorCore -> conservative budget.
    """
    try:
        cap = int(pltpu.get_tpu_info().vmem_capacity_bytes)
    except Exception:
        cap = 64 << 20                        # assume the smallest part (v7x per TC)
    budget = min(48 << 20, cap // 3)          # ~42 MiB on 128-MiB parts, ~21 MiB on v7x
    limit = min(cap * 3 // 4, 96 << 20)       # scoped VMEM limit handed to Mosaic
    return budget, limit


# ---------------------------------------------------------------------------
# Row-tiled linear projection kernel
# ---------------------------------------------------------------------------

def _linear_kernel(x_ref, w_ref, b_ref, o_ref):
    # x: (br, Din), w: (Din, Dout), b: (1, Dout)
    acc = jnp.dot(x_ref[...], w_ref[...], preferred_element_type=jnp.float32)
    o_ref[...] = (acc + b_ref[...]).astype(o_ref.dtype)


def pallas_linear(x, w, b, *, block_rows=512):
    """y = x @ w + b with a row-tiled, pipelined Pallas call."""
    r, din = x.shape
    dout = w.shape[1]
    _, vmem_limit = _vmem_config()
    if r <= block_rows:
        br, grid = r, (1,)                   # full-extent block (no (8,128) issue)
    else:
        br, grid = block_rows, (pl.cdiv(r, block_rows),)   # 512 % 8 == 0
    # TODO(synk): add a K-loop with an f32 VMEM accumulator for very large Din;
    # the full-extent (Din, Dout) weight block is fine at d_model-scale widths.
    return pl.pallas_call(
        _linear_kernel,
        out_shape=jax.ShapeDtypeStruct((r, dout), x.dtype),
        grid=grid,
        in_specs=[
            pl.BlockSpec((br, din), lambda i: (i, 0)),
            pl.BlockSpec((din, dout), lambda i: (0, 0)),
            pl.BlockSpec((1, dout), lambda i: (0, 0)),
        ],
        out_specs=pl.BlockSpec((br, dout), lambda i: (i, 0)),
        compiler_params=pltpu.CompilerParams(
            dimension_semantics=("parallel",),
            vmem_limit_bytes=vmem_limit,
        ),
    )(x, w, b.reshape(1, dout))


# ---------------------------------------------------------------------------
# SegmentCorrelation3 kernel
# ---------------------------------------------------------------------------

def _seg_corr_kernel(q_ref, k_ref, v_ref, o_ref, *, scale, small_path):
    # q_ref: (G, M, E); k_ref/v_ref: (G, N1, E); o_ref: (G, M, E)
    q = q_ref[...]
    k = k_ref[...]
    v = v_ref[...]
    n1 = k.shape[1]

    if small_path:
        # Tiny M*N1: everything on VPU (multiply-add) + XLU (lane reduce) + EUP
        # (exp/reciprocal).  No per-group MXU push/pop bubbles, no N1-wide padded
        # systolic pass, no (G,M,N1) concatenate.
        qf = q.astype(jnp.float32)
        kf = k.astype(jnp.float32)
        vf = v.astype(jnp.float32)
        s = [jnp.sum(qf * kf[:, n:n + 1, :], axis=-1, keepdims=True) * scale
             for n in range(n1)]                                   # each (G, M, 1)
        m = s[0]
        for sn in s[1:]:
            m = jnp.maximum(m, sn)
        p = [jnp.exp(sn - m) for sn in s]
        denom = p[0]
        for pn in p[1:]:
            denom = denom + pn
        inv = pl.reciprocal(denom, approx=True)                    # EUP slot
        o = (p[0] * inv) * vf[:, 0:1, :]
        for n in range(1, n1):
            o = o + (p[n] * inv) * vf[:, n:n + 1, :]
    else:
        # Larger problems: batched MXU matmuls with f32 accumulation.
        s = jnp.einsum('gme,gne->gmn', q, k,
                       preferred_element_type=jnp.float32) * scale  # (G, M, N1)
        s = s - jnp.max(s, axis=-1, keepdims=True)
        p = jnp.exp(s)
        p = p * pl.reciprocal(jnp.sum(p, axis=-1, keepdims=True), approx=True)
        o = jnp.einsum('gmn,gne->gme', p.astype(v.dtype), v,
                       preferred_element_type=jnp.float32)

    o_ref[...] = o.astype(o_ref.dtype)


def _pick_group_size(bh, m, n1, e, itemsize, vmem_budget_bytes):
    """Largest divisor G of B*H whose VMEM footprint fits the budget, while
    keeping >= 2 grid steps (both v7x TensorCores busy) and preferring an even
    grid length."""
    io = 2 * itemsize * (2 * m * e + 2 * n1 * e)        # q+out, k+v, double-buffered
    interm = 4 * (2 * m * n1 + 2 * m * e)               # f32 s, p, accumulator + slack
    per_head = max(io + interm, 1)
    gmax = max(1, vmem_budget_bytes // per_head)
    cap = bh if bh < 2 else bh // 2                     # guarantee >= 2 grid steps
    divisors = [d for d in range(1, bh + 1) if bh % d == 0 and d <= min(gmax, cap)]
    if not divisors:
        divisors = [1]
    even = [d for d in divisors if (bh // d) % 2 == 0]
    return max(even) if even else max(divisors)


# ---------------------------------------------------------------------------
# SegmentCorrelation3 forward (the inner attention)
# ---------------------------------------------------------------------------

def segment_correlation3(queries, keys, values, attn_mask=None, *,
                         factor=1, scale=None, head_flag=True):
    """JAX/Pallas port of SegmentCorrelation3.forward (output_attention=False).

    queries/keys/values: (B, L, H, D).  Returns (V, None).
    attn_mask is accepted for API parity and ignored (the torch module ignores it
    too); attention dropout is an eval-mode identity.
    """
    del attn_mask
    B, L_q, H, D_q = queries.shape
    _, L_k, _, D_k = keys.shape
    _, L_v, _, D_v = values.shape
    L_s = factor
    scale_val = float(scale) if scale is not None else 1.0 / math.sqrt(L_s * D_q)
    assert L_k == L_v
    assert D_q == D_k == D_v
    assert L_s <= L_q and L_s <= L_v

    add_q = L_q % L_s
    add_v = L_v % L_s
    if head_flag:
        queries = queries[:, add_q:]
        keys = keys[:, add_v:]
        values = values[:, add_v:]
        # NOTE: matches the torch module quirk -- addition_Q is taken *after* the
        # slice above (rows add_q..2*add_q-1 get re-prepended), on purpose.
        addition_Q = queries[:, :add_q] if add_q != 0 else None
    else:
        queries = queries[:, :L_q - add_q] if add_q != 0 else queries
        keys = keys[:, :L_k - add_v] if add_v != 0 else keys
        values = values[:, :L_v - add_v] if add_v != 0 else values
        addition_Q = queries[:, -add_q:] if add_q != 0 else None

    M = queries.shape[1] // L_s
    N = keys.shape[1] // L_s
    N1 = N - 1
    if N1 < 1:
        raise ValueError(
            "SegmentCorrelation3 needs at least two key/value segments "
            f"(got N = {N}); softmax over zero segments is undefined.")
    E = L_s * D_q
    # Only lane-pad when the waste is tiny (<= 12.5%); a masked store beats
    # inflating HBM traffic on this memory-bound kernel.
    E_pad = E
    if E % 128 != 0:
        cand = ((E + 127) // 128) * 128
        if (cand - E) * 8 <= E:
            E_pad = cand
    BH = B * H

    seg_q = queries.reshape(B, M, L_s, H, D_q)
    seg_k = keys.reshape(B, N, L_s, H, D_k)[:, :-1]    # keys of segments 0..N-2
    seg_v = values.reshape(B, N, L_s, H, D_v)[:, 1:]   # values of the *next* segment

    # (B, M/N1, L_s, H, D) -> (B*H, M/N1, L_s*D) : one head-major relayout copy.
    q_bh = jnp.transpose(seg_q, (0, 3, 1, 2, 4)).reshape(BH, M, E)
    k_bh = jnp.transpose(seg_k, (0, 3, 1, 2, 4)).reshape(BH, N1, E)
    v_bh = jnp.transpose(seg_v, (0, 3, 1, 2, 4)).reshape(BH, N1, E)

    # Fold torch.roll(tmp_V, 1, dim=1) into the layout pass: rolled output row m
    # only depends on Q-segment m-1, so rotate the queries one segment up front
    # (fuses with the transpose copy above -- no extra HBM pass, no in-kernel roll).
    q_bh = jnp.roll(q_bh, shift=1, axis=1)

    if E_pad != E:
        pad = ((0, 0), (0, 0), (0, E_pad - E))
        q_bh = jnp.pad(q_bh, pad)
        k_bh = jnp.pad(k_bh, pad)
        v_bh = jnp.pad(v_bh, pad)

    vmem_budget, vmem_limit = _vmem_config()
    G = _pick_group_size(BH, M, N1, E_pad, queries.dtype.itemsize, vmem_budget)
    grid = (BH // G,)
    small_path = N1 <= 4          # beyond that, VALU (2 ops/MAC on v5e/v6e) saturates

    out_bh = pl.pallas_call(
        partial(_seg_corr_kernel, scale=scale_val, small_path=small_path),
        out_shape=jax.ShapeDtypeStruct((BH, M, E_pad), queries.dtype),
        grid=grid,
        in_specs=[
            pl.BlockSpec((G, M, E_pad), lambda i: (i, 0, 0)),
            pl.BlockSpec((G, N1, E_pad), lambda i: (i, 0, 0)),
            pl.BlockSpec((G, N1, E_pad), lambda i: (i, 0, 0)),
        ],
        out_specs=pl.BlockSpec((G, M, E_pad), lambda i: (i, 0, 0)),
        compiler_params=pltpu.CompilerParams(
            dimension_semantics=("parallel",),
            vmem_limit_bytes=vmem_limit,
        ),
    )(q_bh, k_bh, v_bh)

    # (B*H, M, E) -> (B, M*L_s, H, D)   (the segment roll is already applied)
    if E_pad != E:
        out_bh = out_bh[:, :, :E]
    out = out_bh.reshape(B, H, M, L_s, D_v)
    V = jnp.transpose(out, (0, 2, 3, 1, 4)).reshape(B, M * L_s, H, D_v)

    if head_flag:
        if addition_Q is not None:
            V = jnp.concatenate([addition_Q, V], axis=1)
    else:
        if addition_Q is not None:
            V = jnp.concatenate([V, addition_Q], axis=1)
    return V, None   # output_attention=False


# ---------------------------------------------------------------------------
# AttentionLayer forward (projections around the inner attention)
# ---------------------------------------------------------------------------

def init_attention_layer_params(key, d_model, n_heads, d_keys=None, d_values=None,
                                dtype=jnp.float32):
    d_keys = d_keys or d_model // n_heads
    d_values = d_values or d_model // n_heads
    ks = jax.random.split(key, 8)

    def lin(kw, kb, fan_in, fan_out):
        bound = 1.0 / math.sqrt(fan_in)
        w = jax.random.uniform(kw, (fan_in, fan_out), dtype, -bound, bound)
        b = jax.random.uniform(kb, (fan_out,), dtype, -bound, bound)
        return w, b

    wq, bq = lin(ks[0], ks[1], d_model, d_keys * n_heads)
    wk, bk = lin(ks[2], ks[3], d_model, d_keys * n_heads)
    wv, bv = lin(ks[4], ks[5], d_model, d_values * n_heads)
    wo, bo = lin(ks[6], ks[7], d_values * n_heads, d_model)
    return dict(wq=wq, bq=bq, wk=wk, bk=bk, wv=wv, bv=bv, wo=wo, bo=bo)


def attention_layer_forward(params, queries, keys, values, attn_mask=None, *,
                            n_heads, factor=1, scale=None, head_flag=True,
                            fuse_qkv=False):
    """AttentionLayer.forward with SegmentCorrelation3 as the inner attention.

    fuse_qkv=True is valid when queries/keys/values are the same tensor
    (self-attention, the typical LTSF usage): the three projections collapse into
    a single matmul that reads the activation from HBM once.
    """
    B, L, _ = queries.shape
    _, S, _ = keys.shape
    H = n_heads
    dqk = params['wq'].shape[1]    # H * d_keys
    vmem_limit = _vmem_config()[1]
    del vmem_limit  # (pallas_linear queries it itself)

    if fuse_qkv:
        w_qkv = jnp.concatenate([params['wq'], params['wk'], params['wv']], axis=1)
        b_qkv = jnp.concatenate([params['bq'], params['bk'], params['bv']])
        qkv = pallas_linear(queries.reshape(B * L, -1), w_qkv, b_qkv)
        q = qkv[:, :dqk].reshape(B, L, H, -1)
        k = qkv[:, dqk:2 * dqk].reshape(B, L, H, -1)
        v = qkv[:, 2 * dqk:].reshape(B, L, H, -1)
    else:
        q = pallas_linear(queries.reshape(B * L, -1), params['wq'],
                          params['bq']).reshape(B, L, H, -1)
        k = pallas_linear(keys.reshape(B * S, -1), params['wk'],
                          params['bk']).reshape(B, S, H, -1)
        v = pallas_linear(values.reshape(B * S, -1), params['wv'],
                          params['bv']).reshape(B, S, H, -1)

    out, attn = segment_correlation3(q, k, v, attn_mask, factor=factor,
                                     scale=scale, head_flag=head_flag)
    out = out.reshape(B, out.shape[1], -1)
    out = pallas_linear(out.reshape(B * out.shape[1], -1), params['wo'], params['bo'])
    return out.reshape(B, L, -1), attn


# ---------------------------------------------------------------------------
# Pure-JAX references (validation only)
# ---------------------------------------------------------------------------

def _seg_corr_reference(queries, keys, values, *, factor, scale=None, head_flag=True):
    B, L_q, H, D_q = queries.shape
    L_s = factor
    scale_val = scale if scale is not None else 1.0 / math.sqrt(L_s * D_q)
    add_q = L_q % L_s
    add_v = keys.shape[1] % L_s
    if head_flag:
        queries = queries[:, add_q:]
        keys = keys[:, add_v:]
        values = values[:, add_v:]
        addition_Q = queries[:, :add_q] if add_q != 0 else None
    else:
        queries = queries[:, :queries.shape[1] - add_q] if add_q != 0 else queries
        keys = keys[:, :keys.shape[1] - add_v] if add_v != 0 else keys
        values = values[:, :values.shape[1] - add_v] if add_v != 0 else values
        addition_Q = queries[:, -add_q:] if add_q != 0 else None
    seg_q = queries.reshape(B, -1, L_s, H, D_q)
    seg_k = keys.reshape(B, -1, L_s, H, D_q)[:, :-1]
    seg_v = values.reshape(B, -1, L_s, H, D_q)[:, 1:]
    scores = jnp.einsum('bmlhd,bnlhd->bhmn', seg_q, seg_k)
    A = jax.nn.softmax(scale_val * scores, axis=-1)
    tmp_V = jnp.einsum('bhmn,bnlhd->bmlhd', A, seg_v)
    V = jnp.roll(tmp_V, shift=1, axis=1).reshape(B, -1, H, D_q)
    if head_flag:
        if addition_Q is not None:
            V = jnp.concatenate([addition_Q, V], axis=1)
    elif addition_Q is not None:
        V = jnp.concatenate([V, addition_Q], axis=1)
    return V


def _attention_layer_reference(params, queries, keys, values, *, n_heads,
                               factor=1, scale=None, head_flag=True):
    B, L, _ = queries.shape
    _, S, _ = keys.shape
    H = n_heads
    q = (queries @ params['wq'] + params['bq']).reshape(B, L, H, -1)
    k = (keys @ params['wk'] + params['bk']).reshape(B, S, H, -1)
    v = (values @ params['wv'] + params['bv']).reshape(B, S, H, -1)
    out = _seg_corr_reference(q, k, v, factor=factor, scale=scale, head_flag=head_flag)
    out = out.reshape(B, L, -1)
    return out @ params['wo'] + params['bo']


# ---------------------------------------------------------------------------
# Demo / self-test
# ---------------------------------------------------------------------------

if __name__ == "__main__":
    B, L, d_model, n_heads = 2, 16, 32, 4
    factor = 4                                    # segment length L_s

    root = jax.random.PRNGKey(0)
    k_x, k_q, k_k, k_v, k_par = jax.random.split(root, 5)
    x = jax.random.normal(k_x, (B, L, d_model), dtype=jnp.float32)
    queries = jax.random.normal(k_q, (B, L, d_model), dtype=jnp.float32)
    keys = jax.random.normal(k_k, (B, L, d_model), dtype=jnp.float32)
    values = jax.random.normal(k_v, (B, L, d_model), dtype=jnp.float32)
    params = init_attention_layer_params(k_par, d_model, n_heads)

    # 1) self-attention path with the fused q/k/v projection
    fwd_self = jax.jit(partial(attention_layer_forward, n_heads=n_heads,
                               factor=factor, fuse_qkv=True))
    out_self, attn = fwd_self(params, x, x, x)
    out_self = jax.block_until_ready(out_self)
    ref_self = _attention_layer_reference(params, x, x, x,
                                          n_heads=n_heads, factor=factor)
    assert out_self.shape == (B, L, d_model)
    assert attn is None
    err = float(jnp.max(jnp.abs(out_self - ref_self)))
    # tolerance covers the EUP approximate-reciprocal used in the kernel softmax
    assert err < 5e-3, f"AttentionLayer (fused qkv) max |err| = {err}"

    # 2) general path: distinct q/k/v tensors, separate projections
    fwd_gen = jax.jit(partial(attention_layer_forward, n_heads=n_heads,
                              factor=factor, fuse_qkv=False))
    out_gen, _ = fwd_gen(params, queries, keys, values)
    out_gen = jax.block_until_ready(out_gen)
    ref_gen = _attention_layer_reference(params, queries, keys, values,
                                         n_heads=n_heads, factor=factor)
    err_gen = float(jnp.max(jnp.abs(out_gen - ref_gen)))
    assert err_gen < 5e-3, f"AttentionLayer (general) max |err| = {err_gen}"

    # 3) inner-attention kernel check on projected q/k/v
    qh = (queries @ params['wq'] + params['bq']).reshape(B, L, n_heads, -1)
    kh = (keys @ params['wk'] + params['bk']).reshape(B, L, n_heads, -1)
    vh = (values @ params['wv'] + params['bv']).reshape(B, L, n_heads, -1)
    v_pallas, _ = segment_correlation3(qh, kh, vh, None, factor=factor, head_flag=True)
    v_pallas = jax.block_until_ready(v_pallas)
    v_ref = _seg_corr_reference(qh, kh, vh, factor=factor, head_flag=True)
    err_attn = float(jnp.max(jnp.abs(v_pallas - v_ref)))
    assert err_attn < 5e-3, f"SegmentCorrelation3 max |err| = {err_attn}"

    print("KERNEL_OK")
</pallas_src>

<mosaic_0001>
module attributes {stable_mosaic.version = 11 : i64} {
  func.func @_linear_kernel(%arg0: i32, %arg1: memref<32x32xf32, #tpu.memory_space<vmem>>, %arg2: memref<32x96xf32, #tpu.memory_space<vmem>>, %arg3: memref<1x96xf32, #tpu.memory_space<vmem>>, %arg4: memref<32x96xf32, #tpu.memory_space<vmem>>) attributes {dimension_semantics = [#tpu.dimension_semantics<parallel>], iteration_bounds = array<i64: 1>, scalar_prefetch = 0 : i64, scratch_operands = 0 : i64, tpu.core_type = #tpu.core_type<tc>, window_params = [{transform_indices = @transform_0, window_bounds = array<i64: 32, 32>}, {pipeline_mode = #tpu.pipeline_mode<synchronous>, transform_indices = @transform_1, window_bounds = array<i64: 32, 96>}, {pipeline_mode = #tpu.pipeline_mode<synchronous>, transform_indices = @transform_2, window_bounds = array<i64: 1, 96>}, {transform_indices = @transform_3, window_bounds = array<i64: 32, 96>}]} {
    %c0 = arith.constant 0 : index
    %c0_0 = arith.constant 0 : index
    %0 = vector.load %arg1[%c0, %c0_0] : memref<32x32xf32, #tpu.memory_space<vmem>>, vector<32x32xf32>
    %c0_1 = arith.constant 0 : index
    %c0_2 = arith.constant 0 : index
    %1 = vector.load %arg2[%c0_1, %c0_2] : memref<32x96xf32, #tpu.memory_space<vmem>>, vector<32x96xf32>
    %cst = arith.constant dense<0.000000e+00> : vector<32x96xf32>
    %2 = tpu.matmul %0, %1, %cst {dimension_numbers = #tpu.dot_dimension_numbers<[1], [0], [0], [1], [0, 0, 1, 1], [], []>} : vector<32x32xf32>, vector<32x96xf32>, vector<32x96xf32> -> vector<32x96xf32>
    %c0_3 = arith.constant 0 : index
    %c0_4 = arith.constant 0 : index
    %3 = vector.load %arg3[%c0_3, %c0_4] : memref<1x96xf32, #tpu.memory_space<vmem>>, vector<1x96xf32>
    %4 = vector.broadcast %3 : vector<1x96xf32> to vector<32x96xf32>
    %5 = arith.addf %2, %4 : vector<32x96xf32>
    %c0_5 = arith.constant 0 : index
    %c0_6 = arith.constant 0 : index
    %6 = vector.load %arg4[%c0_5, %c0_6] : memref<32x96xf32, #tpu.memory_space<vmem>>, vector<32x96xf32>
    tpu.vector_store %arg4[%c0_5, %c0_6], %5 {strides = array<i32>} : memref<32x96xf32, #tpu.memory_space<vmem>>, vector<32x96xf32>,
    return
  }
  func.func @transform_0(%arg0: i32) -> (i32, i32) {
    %c0_i32 = arith.constant 0 : i32
    %c0_i32_0 = arith.constant 0 : i32
    return %arg0, %c0_i32 : i32, i32
  }
  func.func @transform_1(%arg0: i32) -> (i32, i32) {
    %c0_i32 = arith.constant 0 : i32
    %c0_i32_0 = arith.constant 0 : i32
    %c0_i32_1 = arith.constant 0 : i32
    return %c0_i32, %c0_i32_0 : i32, i32
  }
  func.func @transform_2(%arg0: i32) -> (i32, i32) {
    %c0_i32 = arith.constant 0 : i32
    %c0_i32_0 = arith.constant 0 : i32
    %c0_i32_1 = arith.constant 0 : i32
    return %c0_i32, %c0_i32_0 : i32, i32
  }
  func.func @transform_3(%arg0: i32) -> (i32, i32) {
    %c0_i32 = arith.constant 0 : i32
    %c0_i32_0 = arith.constant 0 : i32
    return %arg0, %c0_i32 : i32, i32
  }
}

module attributes {stable_mosaic.version = 11 : i64} {
  func.func @_seg_corr_kernel(%arg0: i32, %arg1: memref<4x4x32xf32, #tpu.memory_space<vmem>>, %arg2: memref<4x3x32xf32, #tpu.memory_space<vmem>>, %arg3: memref<4x3x32xf32, #tpu.memory_space<vmem>>, %arg4: memref<4x4x32xf32, #tpu.memory_space<vmem>>) attributes {dimension_semantics = [#tpu.dimension_semantics<parallel>], iteration_bounds = array<i64: 2>, scalar_prefetch = 0 : i64, scratch_operands = 0 : i64, tpu.core_type = #tpu.core_type<tc>, window_params = [{transform_indices = @transform_0, window_bounds = array<i64: 4, 4, 32>}, {transform_indices = @transform_1, window_bounds = array<i64: 4, 3, 32>}, {transform_indices = @transform_2, window_bounds = array<i64: 4, 3, 32>}, {transform_indices = @transform_3, window_bounds = array<i64: 4, 4, 32>}]} {
    %c0 = arith.constant 0 : index
    %c0_0 = arith.constant 0 : index
    %c0_1 = arith.constant 0 : index
    %0 = vector.load %arg1[%c0, %c0_0, %c0_1] : memref<4x4x32xf32, #tpu.memory_space<vmem>>, vector<4x4x32xf32>
    %c0_2 = arith.constant 0 : index
    %c0_3 = arith.constant 0 : index
    %c0_4 = arith.constant 0 : index
    %1 = vector.load %arg2[%c0_2, %c0_3, %c0_4] : memref<4x3x32xf32, #tpu.memory_space<vmem>>, vector<4x3x32xf32>
    %c0_5 = arith.constant 0 : index
    %c0_6 = arith.constant 0 : index
    %c0_7 = arith.constant 0 : index
    %2 = vector.load %arg3[%c0_5, %c0_6, %c0_7] : memref<4x3x32xf32, #tpu.memory_space<vmem>>, vector<4x3x32xf32>
    %3 = vector.extract_strided_slice %1 {offsets = [0, 0, 0], sizes = [4, 1, 32], strides = [1, 1, 1]} : vector<4x3x32xf32> to vector<4x1x32xf32>
    %4 = vector.broadcast %3 : vector<4x1x32xf32> to vector<4x4x32xf32>
    %5 = arith.mulf %0, %4 : vector<4x4x32xf32>
    %cst = arith.constant dense<0.000000e+00> : vector<4x4xf32>
    %6 = vector.multi_reduction <add>, %5, %cst [2] : vector<4x4x32xf32> to vector<4x4xf32>
    %7 = vector.shape_cast %6 : vector<4x4xf32> to vector<4x4x1xf32>
    %cst_8 = arith.constant 0.176776692 : f32
    %8 = vector.broadcast %cst_8 : f32 to vector<4x4x1xf32>
    %9 = arith.mulf %7, %8 : vector<4x4x1xf32>
    %10 = vector.extract_strided_slice %1 {offsets = [0, 1, 0], sizes = [4, 1, 32], strides = [1, 1, 1]} : vector<4x3x32xf32> to vector<4x1x32xf32>
    %11 = vector.broadcast %10 : vector<4x1x32xf32> to vector<4x4x32xf32>
    %12 = arith.mulf %0, %11 : vector<4x4x32xf32>
    %cst_9 = arith.constant dense<0.000000e+00> : vector<4x4xf32>
    %13 = vector.multi_reduction <add>, %12, %cst_9 [2] : vector<4x4x32xf32> to vector<4x4xf32>
    %14 = vector.shape_cast %13 : vector<4x4xf32> to vector<4x4x1xf32>
    %cst_10 = arith.constant 0.176776692 : f32
    %15 = vector.broadcast %cst_10 : f32 to vector<4x4x1xf32>
    %16 = arith.mulf %14, %15 : vector<4x4x1xf32>
    %17 = vector.extract_strided_slice %1 {offsets = [0, 2, 0], sizes = [4, 1, 32], strides = [1, 1, 1]} : vector<4x3x32xf32> to vector<4x1x32xf32>
    %18 = vector.broadcast %17 : vector<4x1x32xf32> to vector<4x4x32xf32>
    %19 = arith.mulf %0, %18 : vector<4x4x32xf32>
    %cst_11 = arith.constant dense<0.000000e+00> : vector<4x4xf32>
    %20 = vector.multi_reduction <add>, %19, %cst_11 [2] : vector<4x4x32xf32> to vector<4x4xf32>
    %21 = vector.shape_cast %20 : vector<4x4xf32> to vector<4x4x1xf32>
    %cst_12 = arith.constant 0.176776692 : f32
    %22 = vector.broadcast %cst_12 : f32 to vector<4x4x1xf32>
    %23 = arith.mulf %21, %22 : vector<4x4x1xf32>
    %24 = arith.maximumf %9, %16 : vector<4x4x1xf32>
    %25 = arith.maximumf %24, %23 : vector<4x4x1xf32>
    %26 = arith.subf %9, %25 : vector<4x4x1xf32>
    %27 = math.exp %26 : vector<4x4x1xf32>
    %28 = arith.subf %16, %25 : vector<4x4x1xf32>
    %29 = math.exp %28 : vector<4x4x1xf32>
    %30 = arith.subf %23, %25 : vector<4x4x1xf32>
    %31 = math.exp %30 : vector<4x4x1xf32>
    %32 = arith.addf %27, %29 : vector<4x4x1xf32>
    %33 = arith.addf %32, %31 : vector<4x4x1xf32>
    %34 = tpu.reciprocal %33 {approx = true} : vector<4x4x1xf32> -> vector<4x4x1xf32>
    %35 = arith.mulf %27, %34 : vector<4x4x1xf32>
    %36 = vector.extract_strided_slice %2 {offsets = [0, 0, 0], sizes = [4, 1, 32], strides = [1, 1, 1]} : vector<4x3x32xf32> to vector<4x1x32xf32>
    %37 = vector.broadcast %35 : vector<4x4x1xf32> to vector<4x4x32xf32>
    %38 = vector.broadcast %36 : vector<4x1x32xf32> to vector<4x4x32xf32>
    %39 = arith.mulf %37, %38 : vector<4x4x32xf32>
    %40 = arith.mulf %29, %34 : vector<4x4x1xf32>
    %41 = vector.extract_strided_slice %2 {offsets = [0, 1, 0], sizes = [4, 1, 32], strides = [1, 1, 1]} : vector<4x3x32xf32> to vector<4x1x32xf32>
    %42 = vector.broadcast %40 : vector<4x4x1xf32> to vector<4x4x32xf32>
    %43 = vector.broadcast %41 : vector<4x1x32xf32> to vector<4x4x32xf32>
    %44 = arith.mulf %42, %43 : vector<4x4x32xf32>
    %45 = arith.addf %39, %44 : vector<4x4x32xf32>
    %46 = arith.mulf %31, %34 : vector<4x4x1xf32>
    %47 = vector.extract_strided_slice %2 {offsets = [0, 2, 0], sizes = [4, 1, 32], strides = [1, 1, 1]} : vector<4x3x32xf32> to vector<4x1x32xf32>
    %48 = vector.broadcast %46 : vector<4x4x1xf32> to vector<4x4x32xf32>
    %49 = vector.broadcast %47 : vector<4x1x32xf32> to vector<4x4x32xf32>
    %50 = arith.mulf %48, %49 : vector<4x4x32xf32>
    %51 = arith.addf %45, %50 : vector<4x4x32xf32>
    %c0_13 = arith.constant 0 : index
    %c0_14 = arith.constant 0 : index
    %c0_15 = arith.constant 0 : index
    %52 = vector.load %arg4[%c0_13, %c0_14, %c0_15] : memref<4x4x32xf32, #tpu.memory_space<vmem>>, vector<4x4x32xf32>
    tpu.vector_store %arg4[%c0_13, %c0_14, %c0_15], %51 {strides = array<i32>} : memref<4x4x32xf32, #tpu.memory_space<vmem>>, vector<4x4x32xf32>,
    return
  }
  func.func @transform_0(%arg0: i32) -> (i32, i32, i32) {
    %c0_i32 = arith.constant 0 : i32
    %c0_i32_0 = arith.constant 0 : i32
    %c0_i32_1 = arith.constant 0 : i32
    return %arg0, %c0_i32, %c0_i32_0 : i32, i32, i32
  }
  func.func @transform_1(%arg0: i32) -> (i32, i32, i32) {
    %c0_i32 = arith.constant 0 : i32
    %c0_i32_0 = arith.constant 0 : i32
    %c0_i32_1 = arith.constant 0 : i32
    return %arg0, %c0_i32, %c0_i32_0 : i32, i32, i32
  }
  func.func @transform_2(%arg0: i32) -> (i32, i32, i32) {
    %c0_i32 = arith.constant 0 : i32
    %c0_i32_0 = arith.constant 0 : i32
    %c0_i32_1 = arith.constant 0 : i32
    return %arg0, %c0_i32, %c0_i32_0 : i32, i32, i32
  }
  func.func @transform_3(%arg0: i32) -> (i32, i32, i32) {
    %c0_i32 = arith.constant 0 : i32
    %c0_i32_0 = arith.constant 0 : i32
    %c0_i32_1 = arith.constant 0 : i32
    return %arg0, %c0_i32, %c0_i32_0 : i32, i32, i32
  }
}

module attributes {stable_mosaic.version = 11 : i64} {
  func.func @_linear_kernel(%arg0: i32, %arg1: memref<32x32xf32, #tpu.memory_space<vmem>>, %arg2: memref<32x32xf32, #tpu.memory_space<vmem>>, %arg3: memref<1x32xf32, #tpu.memory_space<vmem>>, %arg4: memref<32x32xf32, #tpu.memory_space<vmem>>) attributes {dimension_semantics = [#tpu.dimension_semantics<parallel>], iteration_bounds = array<i64: 1>, scalar_prefetch = 0 : i64, scratch_operands = 0 : i64, tpu.core_type = #tpu.core_type<tc>, window_params = [{transform_indices = @transform_0, window_bounds = array<i64: 32, 32>}, {pipeline_mode = #tpu.pipeline_mode<synchronous>, transform_indices = @transform_1, window_bounds = array<i64: 32, 32>}, {pipeline_mode = #tpu.pipeline_mode<synchronous>, transform_indices = @transform_2, window_bounds = array<i64: 1, 32>}, {transform_indices = @transform_3, window_bounds = array<i64: 32, 32>}]} {
    %c0 = arith.constant 0 : index
    %c0_0 = arith.constant 0 : index
    %0 = vector.load %arg1[%c0, %c0_0] : memref<32x32xf32, #tpu.memory_space<vmem>>, vector<32x32xf32>
    %c0_1 = arith.constant 0 : index
    %c0_2 = arith.constant 0 : index
    %1 = vector.load %arg2[%c0_1, %c0_2] : memref<32x32xf32, #tpu.memory_space<vmem>>, vector<32x32xf32>
    %cst = arith.constant dense<0.000000e+00> : vector<32x32xf32>
    %2 = tpu.matmul %0, %1, %cst {dimension_numbers = #tpu.dot_dimension_numbers<[1], [0], [0], [1], [0, 0, 1, 1], [], []>} : vector<32x32xf32>, vector<32x32xf32>, vector<32x32xf32> -> vector<32x32xf32>
    %c0_3 = arith.constant 0 : index
    %c0_4 = arith.constant 0 : index
    %3 = vector.load %arg3[%c0_3, %c0_4] : memref<1x32xf32, #tpu.memory_space<vmem>>, vector<1x32xf32>
    %4 = vector.broadcast %3 : vector<1x32xf32> to vector<32x32xf32>
    %5 = arith.addf %2, %4 : vector<32x32xf32>
    %c0_5 = arith.constant 0 : index
    %c0_6 = arith.constant 0 : index
    %6 = vector.load %arg4[%c0_5, %c0_6] : memref<32x32xf32, #tpu.memory_space<vmem>>, vector<32x32xf32>
    tpu.vector_store %arg4[%c0_5, %c0_6], %5 {strides = array<i32>} : memref<32x32xf32, #tpu.memory_space<vmem>>, vector<32x32xf32>,
    return
  }
  func.func @transform_0(%arg0: i32) -> (i32, i32) {
    %c0_i32 = arith.constant 0 : i32
    %c0_i32_0 = arith.constant 0 : i32
    return %arg0, %c0_i32 : i32, i32
  }
  func.func @transform_1(%arg0: i32) -> (i32, i32) {
    %c0_i32 = arith.constant 0 : i32
    %c0_i32_0 = arith.constant 0 : i32
    %c0_i32_1 = arith.constant 0 : i32
    return %c0_i32, %c0_i32_0 : i32, i32
  }
  func.func @transform_2(%arg0: i32) -> (i32, i32) {
    %c0_i32 = arith.constant 0 : i32
    %c0_i32_0 = arith.constant 0 : i32
    %c0_i32_1 = arith.constant 0 : i32
    return %c0_i32, %c0_i32_0 : i32, i32
  }
  func.func @transform_3(%arg0: i32) -> (i32, i32) {
    %c0_i32 = arith.constant 0 : i32
    %c0_i32_0 = arith.constant 0 : i32
    return %arg0, %c0_i32 : i32, i32
  }
}

</mosaic_0001>

<bundles_post_ra>
// kernel: attention_layer_forward.3
= control target key start
LH: loop header
LB: loop body
LE: loop exit
PB: predicated region body
PF: predicated region fallthrough
CT: control target
= control target key end

     0   :  { %vm29_vm0 = vcmask 261120   ;;  %vm127_vm1 = vcmask 785408   ;;  %s230_s1 = inlined_call_operand.vmem [shape: f32[32,96], index: 1, kind: input, shape index: {}]   ;;  %s231_s0 = inlined_call_operand.vmem [shape: f32[32,32], index: 0, kind: input, shape index: {}]   ;;  %s232_s2 = inlined_call_operand.vmem [shape: f32[1,96], index: 2, kind: input, shape index: {}]   ;;  %s233_s3 = inlined_call_operand.vmem [shape: f32[32,96], index: 3, kind: output, shape index: {}]  }
   0x1   :  { %v21_v0 = vld [vmem:[%s230_s1 + $0x18] sm:$0xff]  ;;  %v20_v1 = vld [vmem:[%s230_s1 + $0x10] sm:$0xff]  ;;  %v19_v2 = vld [vmem:[%s230_s1 + $0x8] sm:$0xff] }
   0x2   :  { %149 = vmatprep.subr.mxu0 %v21_v0  ;;  %163 = vmatprep.subr.mxu1 %v21_v0  ;;  %v18_v3 = vld [vmem:[%s230_s1] sm:$0xff]  ;;  %v16_v5 = vld [vmem:[%s231_s0 + $0x10] sm:$0xff]  ;;  %v15_v6 = vld [vmem:[%s231_s0 + $0x8] sm:$0xff] }
   0x3   :  { %150 = vmatpush3.msra.mxu0 %v21_v0  ;;  %167 = vmatpush3.msra.mxu1 %v21_v0  ;;  %v14_v4 = vld [vmem:[%s231_s0] sm:$0xff]  ;;  %v17_v7 = vld [vmem:[%s231_s0 + $0x18] sm:$0xff] }
   0x4   :  { %151 = vmatprep.subr.mxu0 %v20_v1  ;;  %164 = vmatprep.subr.mxu1 %v20_v1  ;;  %v136_v8 = vld [vmem:[%s232_s2] ss:$0 sm:$0xff] }
   0x5   :  { %152 = vmatpush3.msra.mxu0 %v20_v1  ;;  %168 = vmatpush3.msra.mxu1 %v20_v1 }
   0x6   :  { %153 = vmatprep.subr.mxu0 %v19_v2  ;;  %165 = vmatprep.subr.mxu1 %v19_v2 }
   0x7   :  { %154 = vmatpush3.msra.mxu0 %v19_v2  ;;  %169 = vmatpush3.msra.mxu1 %v19_v2 }
   0x8   :  { %155 = vmatprep.subr.mxu0 %v18_v3  ;;  %166 = vmatprep.subr.mxu1 %v18_v3 }
   0x9   :  { %156 = vmatpush3.msra.mxu0 %v18_v3  ;;  %170 = vmatpush3.msra.mxu1 %v18_v3 }
   0xa   :  { %157 = vmatprep.mubr.msk.f32.mxu0 %vm29_vm0, %v14_v4  ;;  %160 = vmatprep.mubr.msk.f32.mxu1 %vm29_vm0, %v16_v5 }
   0xb   :  { %158 = vmatmul.mubr.msk.f32.vlgmr.msra.gmra.mxu0 %vm29_vm0, %v15_v6  ;;  %161 = vmatmul.mubr.msk.f32.vlgmr.msra.gmra.mxu1 %vm29_vm0, %v17_v7 }
  0xcb   :  { %v159_v9 = vpop.f32.mrf.mxu0  ;;  %v162_v10 = vpop.f32.mrf.mxu1 }
  0xcc   :  { %v114_v11 = vadd.f32 %v159_v9, %v136_v8  ;;  %v124_v12 = vadd.f32 %v162_v10, %v136_v8 }
  0xcd   :  { %v108_v13 = vpop.f32.mrf.mxu0  ;;  %v118_v14 = vpop.f32.mrf.mxu1 }
  0xce   :  { %129 = vst.msk [vmem:[%s233_s3 + $0x8] sm:$0xff] %vm127_vm1, %v114_v11  ;;  %131 = vst.msk [vmem:[%s233_s3 + $0x18] sm:$0xff] %vm127_vm1, %v124_v12  ;;  %v109_v15 = vadd.f32 %v136_v8, %v108_v13  ;;  %v119_v16 = vadd.f32 %v136_v8, %v118_v14 }
  0xd0   :  { %128 = vst.msk [vmem:[%s233_s3] sm:$0xff] %vm127_vm1, %v109_v15  ;;  %130 = vst.msk [vmem:[%s233_s3 + $0x10] sm:$0xff] %vm127_vm1, %v119_v16 }

// kernel: attention_layer_forward.4
= control target key start
LH: loop header
LB: loop body
LE: loop exit
PB: predicated region body
PF: predicated region fallthrough
CT: control target
= control target key end

     0   :  { %s642_s12 = smov 0   ;;  %s767_s0 = inlined_call_operand.vmem [shape: f32[8,4,32], index: 0, kind: input, shape index: {}]   ;;  %s768_s1 = inlined_call_operand.vmem [shape: f32[8,3,32], index: 1, kind: input, shape index: {}]   ;;  %s769_s2 = inlined_call_operand.vmem [shape: f32[8,3,32], index: 2, kind: input, shape index: {}]   ;;  %s770_s3 = inlined_call_operand.vmem [shape: f32[8,4,32], index: 3, kind: output, shape index: {}]  }
   0x1 LB: > { %s559_s13 = sadd.s32 4294967295, %s620_s12   ;;  %p563_p0 = scmp.ge.s32.totalorder %s620_s12, 1  ;;  %s620_s12 = sphi %s642_s12, %s13_s12  }
   0x2   : > { %p160_p1 = scmp.lt.s32.totalorder %s620_s12, 3 }
   0x4   : > { %p161_p2 = pnand %p563_p0, %p160_p1 }
   0x5   : > { %s564_s14 = sshll.u32 (!%p161_p2), %s559_s13, 2 }
   0x6   : > { %164 = sbr.rel (%p161_p2) target bundleno = 234 (0xea), region = 32  ;;  %p195_p3 = scmp.lt.s32.totalorder (!%p161_p2), %s564_s14, 7 }
   0xb   : > { %v230_v0 = vlaneseq  ;;  %s772_s14 = smov (!%p195_p3, %s564_s14), 7  ;;  %vm250_vm0 = vcmask 257024  }
   0xc   : > { %s654_s15 = sshll.u32 %s772_s14, 2 }
   0xd   : > { %v231_v1 = vshrl.u32 %v230_v0, 7  ;;  %s660_s18 = scalar_lea.vmem %s767_s0, %s654_s15  ;;  %s204_s21 = scalar_lea.vmem %s768_s1, %s654_s15 }
   0xe   : > { %s210_s24 = scalar_lea.vmem %s769_s2, %s654_s15  ;;  %v219_v4 = vld [vmem:[%s660_s18 + $0x4] sm:$0xf]  ;;  %v222_v16 = vld [vmem:[%s204_s21] sm:$0x7]  ;;  %v224_v22 = vld [vmem:[%s204_s21 + $0x8] sm:$0x7]  ;;  %s216_s27 = scalar_lea.vmem %s770_s3, %s654_s15 }
   0xf   : > { %v650_v2 = vsub.s32 0, %v231_v1  ;;  %v652_v3 = vsub.s32 1, %v231_v1  ;;  %v223_v5 = vld [vmem:[%s204_s21 + $0x4] sm:$0x7]  ;;  %v671_v6 = vld [vmem:[%s210_s24] sm:$0x7] }
  0x10   : > { %v673_v7 = vld [vmem:[%s210_s24 + $0x4] sm:$0x7]  ;;  %v675_v8 = vld [vmem:[%s210_s24 + $0x8] sm:$0x7]  ;;  %v679_v11 = vld [vmem:[%s210_s24 + $0xc] sm:$0x7] }
  0x11   : > { %v237_v9 = vrot.slane %v223_v5, %v650_v2  ;;  %v274_v10 = vrot.slane %v223_v5, %v652_v3  ;;  %v402_v12 = vrot.slane %v671_v6, %v650_v2  ;;  %v406_v13 = vrot.slane %v673_v7, %v650_v2  ;;  %v218_v21 = vld [vmem:[%s660_s18] sm:$0xf]  ;;  %v220_v27 = vld [vmem:[%s660_s18 + $0x8] sm:$0xf]  ;;  %v225_v28 = vld [vmem:[%s204_s21 + $0xc] sm:$0x7] }
  0x12   : > { %v410_v14 = vrot.slane %v675_v8, %v650_v2  ;;  %v426_v15 = vrot.slane %v671_v6, %v652_v3  ;;  %v414_v18 = vrot.slane %v679_v11, %v650_v2  ;;  %v430_v19 = vrot.slane %v673_v7, %v652_v3  ;;  %v221_v39 = vld [vmem:[%s660_s18 + $0xc] sm:$0xf] }
  0x13   : > { %v247_v17 = vmul.f32 %v237_v9, %v219_v4  ;;  %v434_v20 = vrot.slane %v675_v8, %v652_v3  ;;  %v438_v23 = vrot.slane %v679_v11, %v652_v3  ;;  %v233_v24 = vrot.slane %v222_v16, %v650_v2 }
  0x14   : > { %v284_v25 = vmul.f32 %v274_v10, %v219_v4  ;;  %v270_v26 = vrot.slane %v222_v16, %v652_v3  ;;  %v278_v30 = vrot.slane %v224_v22, %v652_v3  ;;  %v241_v33 = vrot.slane %v224_v22, %v650_v2 }
  0x15   : > { %v254_v29 = vsel %vm250_vm0, %v247_v17, 0.0  ;;  %v246_v31 = vmul.f32 %v233_v24, %v218_v21  ;;  %v704_v34 = vsub.s32 2, %v231_v1  ;;  %v245_v37 = vrot.slane %v225_v28, %v650_v2 }
  0x16   : > { %255 = vadd.xlane.f32.xlu1 %v254_v29  ;;  %v283_v32 = vmul.f32 %v270_v26, %v218_v21  ;;  %v290_v35 = vsel %vm250_vm0, %v284_v25, 0.0  ;;  %v285_v36 = vmul.f32 %v278_v30, %v220_v27  ;;  %v248_v41 = vmul.f32 %v241_v33, %v220_v27 }
  0x17   : > { %v251_v38 = vsel %vm250_vm0, %v246_v31, 0.0  ;;  %v306_v42 = vrot.slane %v222_v16, %v704_v34  ;;  %v249_v44 = vmul.f32 %v245_v37, %v221_v39  ;;  %v310_v45 = vrot.slane %v223_v5, %v704_v34 }
  0x18   : > { %252 = vadd.xlane.f32.xlu0 %v251_v38  ;;  %v287_v40 = vsel %vm250_vm0, %v283_v32, 0.0  ;;  %v293_v43 = vsel %vm250_vm0, %v285_v36, 0.0  ;;  %v257_v46 = vsel %vm250_vm0, %v248_v41, 0.0  ;;  %v282_v48 = vrot.slane %v225_v28, %v652_v3 }
  0x19   : > { %v319_v47 = vmul.f32 %v306_v42, %v218_v21  ;;  %v260_v49 = vsel %vm250_vm0, %v249_v44, 0.0  ;;  %v320_v50 = vmul.f32 %v310_v45, %v219_v4  ;;  %v318_v51 = vrot.slane %v225_v28, %v704_v34 }
  0x1a   : > { %291 = vadd.xlane.f32.xlu1 %v290_v35  ;;  %v286_v53 = vmul.f32 %v282_v48, %v221_v39  ;;  %v314_v54 = vrot.slane %v224_v22, %v704_v34 }
  0x1b   : > { %v323_v52 = vsel %vm250_vm0, %v319_v47, 0.0  ;;  %v326_v55 = vsel %vm250_vm0, %v320_v50, 0.0  ;;  %v322_v56 = vmul.f32 %v318_v51, %v221_v39 }
  0x1c   : > { %288 = vadd.xlane.f32.xlu0 %v287_v40  ;;  %v296_v57 = vsel %vm250_vm0, %v286_v53, 0.0  ;;  %v321_v58 = vmul.f32 %v314_v54, %v220_v27 }
  0x1d   : > { %v332_v59 = vsel %vm250_vm0, %v322_v56, 0.0 }
  0x1e   : > { %294 = vadd.xlane.f32.xlu1 %v293_v43  ;;  %v329_v60 = vsel %vm250_vm0, %v321_v58, 0.0 }
  0x20   : > { %258 = vadd.xlane.f32.xlu0 %v257_v46 }
  0x22   : > { %261 = vadd.xlane.f32.xlu1 %v260_v49 }
  0x24   : > { %324 = vadd.xlane.f32.xlu0 %v323_v52 }
  0x26   : > { %327 = vadd.xlane.f32.xlu1 %v326_v55 }
  0x28   : > { %297 = vadd.xlane.f32.xlu0 %v296_v57 }
  0x2a   : > { %333 = vadd.xlane.f32.xlu1 %v332_v59 }
  0x2c   : > { %330 = vadd.xlane.f32.xlu0 %v329_v60 }
  0x9f   : > { %v256_v61 = vpop.xlane.xlu1 %255 }
  0xa0   : > { %v264_v17 = vmul.f32 0.17677669, %v256_v61 }
  0xa1   : > { %v253_v62 = vpop.xlane.xlu0 %252 }
  0xa2   : > { %v263_v16 = vmul.f32 0.17677669, %v253_v62 }
  0xa3   : > { %v292_v63 = vpop.xlane.xlu1 %291 }
  0xa4   : > { %v300_v10 = vmul.f32 0.17677669, %v292_v63 }
  0xa5   : > { %v289_v0 = vpop.xlane.xlu0 %288 }
  0xa6   : > { %v299_v5 = vmul.f32 0.17677669, %v289_v0  ;;  %v340_v26 = vmax.f32 %v264_v17, %v300_v10 }
  0xa7   : > { %v295_v1 = vpop.xlane.xlu1 %294 }
  0xa8   : > { %v339_v22 = vmax.f32 %v263_v16, %v299_v5  ;;  %v301_v29 = vmul.f32 0.17677669, %v295_v1 }
  0xa9   : > { %v259_v4 = vpop.xlane.xlu0 %258 }
  0xaa   : > { %v265_v30 = vmul.f32 0.17677669, %v259_v4 }
  0xab   : > { %v262_v9 = vpop.xlane.xlu1 %261 }
  0xac   : > { %v266_v31 = vmul.f32 0.17677669, %v262_v9  ;;  %v341_v53 = vmax.f32 %v265_v30, %v301_v29 }
  0xad   : > { %v325_v21 = vpop.xlane.xlu0 %324 }
  0xae   : > { %v335_v24 = vmul.f32 0.17677669, %v325_v21 }
  0xaf   : > { %v328_v25 = vpop.xlane.xlu1 %327 }
  0xb0   : > { %v336_v27 = vmul.f32 0.17677669, %v328_v25  ;;  %v343_v28 = vmax.f32 %v339_v22, %v335_v24 }
  0xb1   : > { %v298_v33 = vpop.xlane.xlu0 %297 }
  0xb2   : > { %v344_v32 = vmax.f32 %v340_v26, %v336_v27  ;;  %v347_v35 = vsub.f32 %v263_v16, %v343_v28  ;;  %v359_v36 = vsub.f32 %v299_v5, %v343_v28  ;;  %v371_v37 = vsub.f32 %v335_v24, %v343_v28 }
  0xb3   : > { %v302_v38 = vmul.f32 0.17677669, %v298_v33  ;;  %v334_v39 = vpop.xlane.xlu1 %333 }
  0xb4   : > { %v348_v40 = vsub.f32 %v264_v17, %v344_v32  ;;  %v360_v41 = vsub.f32 %v300_v10, %v344_v32  ;;  %v372_v42 = vsub.f32 %v336_v27, %v344_v32  ;;  %v338_v43 = vmul.f32 0.17677669, %v334_v39 }
  0xb5   : > { %v351_v44 = vmul.f32 1.442695, %v347_v35  ;;  %v363_v45 = vmul.f32 1.442695, %v359_v36  ;;  %v375_v46 = vmul.f32 1.442695, %v371_v37  ;;  %v342_v47 = vmax.f32 %v266_v31, %v302_v38  ;;  %v331_v49 = vpop.xlane.xlu0 %330 }
  0xb6   : > { %v353_v48 = vmul.f32 1.442695, %v348_v40  ;;  %v365_v50 = vmul.f32 1.442695, %v360_v41  ;;  %v337_v52 = vmul.f32 0.17677669, %v331_v49  ;;  %v454_v40 = vrot.slane %v671_v6, %v704_v34 }
  0xb7   : > { %582 = vpow2.f32 %v351_v44  ;;  %v346_v51 = vmax.f32 %v342_v47, %v338_v43  ;;  %v377_v54 = vmul.f32 1.442695, %v372_v42  ;;  %v458_v47 = vrot.slane %v673_v7, %v704_v34 }
  0xb8   : > { %584 = vpow2.f32 %v363_v45  ;;  %v345_v58 = vmax.f32 %v341_v53, %v337_v52 }
  0xb9   : > { %586 = vpow2.f32 %v375_v46  ;;  %v350_v55 = vsub.f32 %v266_v31, %v346_v51  ;;  %v362_v56 = vsub.f32 %v302_v38, %v346_v51  ;;  %v374_v57 = vsub.f32 %v338_v43, %v346_v51 }
  0xba   : > { %588 = vpow2.f32 %v353_v48  ;;  %v349_v62 = vsub.f32 %v265_v30, %v345_v58  ;;  %v361_v63 = vsub.f32 %v301_v29, %v345_v58  ;;  %v373_v0 = vsub.f32 %v337_v52, %v345_v58 }
  0xbb   : > { %590 = vpow2.f32 %v365_v50  ;;  %v357_v59 = vmul.f32 1.442695, %v350_v55  ;;  %v369_v60 = vmul.f32 1.442695, %v362_v56  ;;  %v381_v61 = vmul.f32 1.442695, %v374_v57 }
  0xbc   : > { %592 = vpow2.f32 %v377_v54  ;;  %v355_v1 = vmul.f32 1.442695, %v349_v62  ;;  %v367_v4 = vmul.f32 1.442695, %v361_v63  ;;  %v379_v5 = vmul.f32 1.442695, %v373_v0 }
  0xbd   : > { %594 = vpow2.f32 %v357_v59 }
  0xbe   : > { %596 = vpow2.f32 %v369_v60 }
  0xbf   : > { %598 = vpow2.f32 %v381_v61 }
  0xc0   : > { %600 = vpow2.f32 %v355_v1 }
  0xc1   : > { %602 = vpow2.f32 %v367_v4 }
  0xc2   : > { %604 = vpow2.f32 %v379_v5 }
  0xc4   : > { %v583_v9 = vpop.eup %582 }
  0xc5   : > { %v585_v10 = vpop.eup %584 }
  0xc6   : > { %v587_v16 = vpop.eup %586  ;;  %v383_v17 = vadd.f32 %v585_v10, %v583_v9 }
  0xc7   : > { %v589_v21 = vpop.eup %588 }
  0xc8   : > { %v591_v22 = vpop.eup %590  ;;  %v387_v24 = vadd.f32 %v587_v16, %v383_v17 }
  0xc9   : > { %v593_v25 = vpop.eup %592  ;;  %v384_v26 = vadd.f32 %v591_v22, %v589_v21 }
  0xca   : > { %v595_v27 = vpop.eup %594  ;;  %606 = vrcp.f32 %v387_v24 }
  0xcb   : > { %v597_v28 = vpop.eup %596  ;;  %v388_v29 = vadd.f32 %v593_v25, %v384_v26 }
  0xcc   : > { %v599_v30 = vpop.eup %598  ;;  %v386_v31 = vadd.f32 %v597_v28, %v595_v27 }
  0xcd   : > { %v601_v32 = vpop.eup %600  ;;  %608 = vrcp.f32 %v388_v29 }
  0xce   : > { %v603_v33 = vpop.eup %602  ;;  %v390_v35 = vadd.f32 %v599_v30, %v386_v31 }
  0xcf   : > { %v385_v36 = vadd.f32 %v603_v33, %v601_v32  ;;  %v605_v37 = vpop.eup %604 }
  0xd0   : > { %610 = vrcp.f32 %v390_v35 }
  0xd1   : > { %v389_v38 = vadd.f32 %v605_v37, %v385_v36 }
  0xd3   : > { %612 = vrcp.f32 %v389_v38 }
  0xd7   : > { %v607_v39 = vpop.eup %606 }
  0xd8   : > { %v395_v41 = vmul.f32 %v607_v39, %v583_v9  ;;  %v419_v42 = vmul.f32 %v607_v39, %v585_v10  ;;  %v447_v43 = vmul.f32 %v607_v39, %v587_v16 }
  0xda   : > { %v609_v44 = vpop.eup %608  ;;  %v415_v45 = vmul.f32 %v402_v12, %v395_v41  ;;  %v439_v46 = vmul.f32 %v426_v15, %v419_v42  ;;  %v467_v52 = vmul.f32 %v454_v40, %v447_v43  ;;  %v466_v15 = vrot.slane %v679_v11, %v704_v34 }
  0xdb   : > { %v396_v48 = vmul.f32 %v609_v44, %v589_v21  ;;  %v420_v49 = vmul.f32 %v609_v44, %v591_v22  ;;  %v448_v50 = vmul.f32 %v609_v44, %v593_v25 }
  0xdc   : > { %v443_v51 = vadd.f32 %v439_v46, %v415_v45 }
  0xdd   : > { %v611_v53 = vpop.eup %610  ;;  %v416_v12 = vmul.f32 %v406_v13, %v396_v48  ;;  %v440_v6 = vmul.f32 %v430_v19, %v420_v49  ;;  %v468_v59 = vmul.f32 %v458_v47, %v448_v50  ;;  %v462_v19 = vrot.slane %v675_v8, %v704_v34 }
  0xde   : > { %v471_v54 = vadd.f32 %v467_v52, %v443_v51  ;;  %v398_v55 = vmul.f32 %v611_v53, %v595_v27  ;;  %v422_v56 = vmul.f32 %v611_v53, %v597_v28  ;;  %v450_v57 = vmul.f32 %v611_v53, %v599_v30 }
  0xdf   : > { %v444_v58 = vadd.f32 %v440_v6, %v416_v12 }
  0xe0   : > { %v613_v60 = vpop.eup %612  ;;  %475 = vst.msk [vmem:[%s216_s27] sm:$0xf] %vm250_vm0, %v471_v54  ;;  %v418_v13 = vmul.f32 %v414_v18, %v398_v55  ;;  %v442_v7 = vmul.f32 %v438_v23, %v422_v56  ;;  %v470_v4 = vmul.f32 %v466_v15, %v450_v57 }
  0xe1   : > { %v472_v61 = vadd.f32 %v468_v59, %v444_v58  ;;  %v397_v62 = vmul.f32 %v613_v60, %v601_v32  ;;  %v421_v63 = vmul.f32 %v613_v60, %v603_v33  ;;  %v449_v0 = vmul.f32 %v613_v60, %v605_v37 }
  0xe2   : > { %v446_v1 = vadd.f32 %v442_v7, %v418_v13 }
  0xe3   : > { %476 = vst.msk [vmem:[%s216_s27 + $0x4] sm:$0xf] %vm250_vm0, %v472_v61  ;;  %v417_v5 = vmul.f32 %v410_v14, %v397_v62  ;;  %v441_v11 = vmul.f32 %v434_v20, %v421_v63  ;;  %v469_v9 = vmul.f32 %v462_v19, %v449_v0 }
  0xe4   : > { %v474_v18 = vadd.f32 %v470_v4, %v446_v1 }
  0xe5   : > { %v445_v23 = vadd.f32 %v441_v11, %v417_v5 }
  0xe6   : > { %478 = vst.msk [vmem:[%s216_s27 + $0xc] sm:$0xf] %vm250_vm0, %v474_v18 }
  0xe7   : > { %v473_v34 = vadd.f32 %v469_v9, %v445_v23 }
  0xe9   : > { %477 = vst.msk [vmem:[%s216_s27 + $0x8] sm:$0xf] %vm250_vm0, %v473_v34 }
  0xea PF: > { %s13_s12 = sadd.s32 1, %s620_s12  }
  0xeb   : > { %p10_p4 = scmp.ge.s32.totalorder %s13_s12, 4  }
  0xed   :  { %12 = sbr.rel (!%p10_p4) target bundleno = 1 (0x1), region = 68 }

// kernel: attention_layer_forward.5
= control target key start
LH: loop header
LB: loop body
LE: loop exit
PB: predicated region body
PF: predicated region fallthrough
CT: control target
= control target key end

     0   :  { %s269_s0 = inlined_call_operand.vmem [shape: f32[32,32], index: 0, kind: input, shape index: {}]   ;;  %s270_s1 = inlined_call_operand.vmem [shape: f32[32,32], index: 1, kind: input, shape index: {}]   ;;  %s271_s2 = inlined_call_operand.vmem [shape: f32[1,32], index: 2, kind: input, shape index: {}]   ;;  %s272_s3 = inlined_call_operand.hbm [shape: f32[32,32], index: 3, kind: output, shape index: {}]  }
   0x1   :  { %v22_v0 = vld [vmem:[%s270_s1 + $0x18] sm:$0xff]  ;;  %v21_v1 = vld [vmem:[%s270_s1 + $0x10] sm:$0xff]  ;;  %v20_v2 = vld [vmem:[%s270_s1 + $0x8] sm:$0xff] }
   0x2   :  { %161 = vmatprep.subr.mxu0 %v22_v0  ;;  %175 = vmatprep.subr.mxu1 %v22_v0 }
   0x3   :  { %162 = vmatpush3.msra.mxu0 %v22_v0  ;;  %179 = vmatpush3.msra.mxu1 %v22_v0 }
   0x4   :  { %8 = vsyncpa [#allocation3], 0  ;;  %163 = vmatprep.subr.mxu0 %v21_v1  ;;  %176 = vmatprep.subr.mxu1 %v21_v1  ;;  %v19_v3 = vld [vmem:[%s270_s1] sm:$0xff]  ;;  %vm30_vm0 = vcmask 261120   ;;  %v17_v5 = vld [vmem:[%s269_s0 + $0x10] sm:$0xff]  ;;  %s208_s29 = smov [#allocation2]  }
   0x5   :  { %164 = vmatpush3.msra.mxu0 %v21_v1  ;;  %180 = vmatpush3.msra.mxu1 %v21_v1  ;;  %v15_v4 = vld [vmem:[%s269_s0] sm:$0xff]  ;;  %v16_v6 = vld [vmem:[%s269_s0 + $0x8] sm:$0xff]  ;;  %v18_v7 = vld [vmem:[%s269_s0 + $0x18] sm:$0xff]  ;;  %s137_s30 = sshll.u32 %s208_s29, 4  ;;  %s138_s30 = int_to_ptr.vmem [resolvable:$true] %s137_s30 }
   0x6   :  { %165 = vmatprep.subr.mxu0 %v20_v2  ;;  %177 = vmatprep.subr.mxu1 %v20_v2  ;;  %v148_v8 = vld [vmem:[%s271_s2] ss:$0 sm:$0xff]  ;;  %s186_s0 = scalar_lea.vmem %s138_s30, 512  ;;  %p191_p1 = scmp.lt.s32.totalorder %s138_s30, %s138_s30 }
   0x7   :  { %166 = vmatpush3.msra.mxu0 %v20_v2  ;;  %181 = vmatpush3.msra.mxu1 %v20_v2  ;;  %p187_p0 = scmp.ne.s32.totalorder %s138_s30, %s186_s0  ;;  %p192_p2 = scmp.lt.s32.totalorder %s186_s0, %s186_s0 }
   0x8   :  { %167 = vmatprep.subr.mxu0 %v19_v3  ;;  %178 = vmatprep.subr.mxu1 %v19_v3 }
   0x9   :  { %168 = vmatpush3.msra.mxu0 %v19_v3  ;;  %182 = vmatpush3.msra.mxu1 %v19_v3  ;;  %p193_p3 = por %p192_p2, %p191_p1 }
   0xa   :  { %169 = vmatprep.mubr.msk.f32.mxu0 %vm30_vm0, %v15_v4  ;;  %172 = vmatprep.mubr.msk.f32.mxu1 %vm30_vm0, %v17_v5 }
   0xb   :  { %170 = vmatmul.mubr.msk.f32.vlgmr.msra.gmra.mxu0 %vm30_vm0, %v16_v6  ;;  %173 = vmatmul.mubr.msk.f32.vlgmr.msra.gmra.mxu1 %vm30_vm0, %v18_v7  ;;  %p194_p4 = pnand %p193_p3, %p187_p0 }
  0xcb   :  { %v171_v9 = vpop.f32.mrf.mxu0  ;;  %v174_v10 = vpop.f32.mrf.mxu1 }
  0xcc   :  { %v115_v11 = vadd.f32 %v171_v9, %v148_v8  ;;  %v125_v12 = vadd.f32 %v174_v10, %v148_v8 }
  0xcd   :  { %v109_v13 = vpop.f32.mrf.mxu0  ;;  %v119_v14 = vpop.f32.mrf.mxu1 }
  0xce   :  { %129 = vst.msk [vmem:[#allocation2 + $0x8] sm:$0xff] %vm30_vm0, %v115_v11  ;;  %131 = vst.msk [vmem:[#allocation2 + $0x18] sm:$0xff] %vm30_vm0, %v125_v12  ;;  %v110_v15 = vadd.f32 %v148_v8, %v109_v13  ;;  %v120_v16 = vadd.f32 %v148_v8, %v119_v14 }
  0xd0   :  { %128 = vst.msk [vmem:[#allocation2] sm:$0xff] %vm30_vm0, %v110_v15  ;;  %130 = vst.msk [vmem:[#allocation2 + $0x10] sm:$0xff] %vm30_vm0, %v120_v16 }
  0xd1   :  { %197 = shalt.err (!%p194_p4)
}
  0xd2   :  { %s209_s2 = smov 128   ;;  %s210_s4 = smov 8  }
  0xd3   :  { %143 = dma.vmem_to_hbm [thread:$0]  %s138_s30, 512, %s272_s3, [#allocation3], %s209_s2, %s209_s2, %s210_s4  }
  0xd4   :  { %206 = dma.done.wait [#allocation3], 512  }
  0xd5   :  { %207 = vsyncadd [#allocation3], 4294966784 }
  0xd6   :  { %147 = vsyncpa [#allocation3], 1 }

</bundles_post_ra>
